<compile_context>
chip_gen: v6e
topology: v6e:2x2x1
jax: 0.10.0
libtpu: 0.0.40
codegen_flags: <defaults>
</compile_context>

<pallas_src>
import jax
import jax.numpy as jnp
from jax.experimental import pallas as pl
from jax.experimental.pallas import tpu as pltpu

EPS = 1e-5


def _round_up(v, m):
    return (v + m - 1) // m * m


def _layernorm_rows(x_f32):
    # Single pass: sum and sum-of-squares (independent XLU reductions),
    # var = E[x^2] - mean^2.
    d = x_f32.shape[-1]
    inv_d = 1.0 / d
    mean = jnp.sum(x_f32, axis=-1, keepdims=True) * inv_d
    mean_sq = jnp.sum(x_f32 * x_f32, axis=-1, keepdims=True) * inv_d
    var = mean_sq - mean * mean
    return (x_f32 - mean) * jax.lax.rsqrt(var + EPS)


def _ln_matmul_kernel(x_ref, w_ref, b_ref, o_ref):
    # Normalize (f32 stats) then matmul with f32 accumulation.
    y = _layernorm_rows(x_ref[...].astype(jnp.float32)).astype(w_ref.dtype)
    acc = jnp.dot(y, w_ref[...], preferred_element_type=jnp.float32)
    o_ref[...] = (acc + b_ref[...]).astype(o_ref.dtype)


def _ln_cached_matmul_kernel(x_ref, w_ref, b_ref, o_ref, y_ref):
    # rows-outer / H-inner variant: normalize once per row tile (j == 0) and
    # reuse the cached rows for every H tile of that row tile.
    @pl.when(pl.program_id(1) == 0)
    def _():
        y = _layernorm_rows(x_ref[...].astype(jnp.float32))
        y_ref[...] = y.astype(y_ref.dtype)

    acc = jnp.dot(y_ref[...], w_ref[...], preferred_element_type=jnp.float32)
    o_ref[...] = (acc + b_ref[...]).astype(o_ref.dtype)


def fold_prenorm_params(gamma, beta, w, wb, *, gemm_dtype=None):
    """Fold the LayerNorm affine into the linear layer (exact f32 algebra).

    LN(x) = xhat*gamma + beta, Linear(z) = z@W + wb
      =>  Linear(LN(x)) = xhat @ (diag(gamma) @ W) + (beta @ W + wb)

    Call ONCE alongside the weights (hoisted out of the per-call hot path).
    gemm_dtype defaults to bfloat16 (native MXU operands); pass jnp.float32
    for an exact f32 GEMM.
    """
    gamma_f = jnp.reshape(gamma, (-1,)).astype(jnp.float32)
    beta_f = jnp.reshape(beta, (-1,)).astype(jnp.float32)
    w_f = w.astype(jnp.float32)
    if gemm_dtype is None:
        gemm_dtype = jnp.bfloat16
    w_eff = (gamma_f[:, None] * w_f).astype(gemm_dtype)
    b_eff = (beta_f[None, :] @ w_f) + jnp.reshape(wb, (1, -1)).astype(jnp.float32)
    return w_eff, b_eff.astype(jnp.float32)


def prenorm_apply(x, w_eff, b_eff, *, row_tile=512, h_tile=512):
    """Linear(LayerNorm(x)) with pre-folded params.  x: [..., D] -> [..., H]."""
    *lead, D = x.shape
    assert w_eff.shape[0] == D
    H = w_eff.shape[1]
    R = 1
    for s in lead:
        R *= s

    x2 = x.reshape(R, D)
    out_dtype = x.dtype
    gemm_dtype = w_eff.dtype

    # ---- generation-aware VMEM budget --------------------------------------
    try:
        cap = int(pltpu.get_tpu_info().vmem_capacity_bytes)
    except Exception:
        cap = 64 * 1024 * 1024
    budget = (cap * 3) // 4       # ~96 MiB on v5e/v6e, ~48 MiB on v7x
    vmem_limit = (cap * 7) // 8   # ~112 MiB on v5e/v6e, ~56 MiB on v7x

    bx = jnp.dtype(x.dtype).itemsize
    bg = jnp.dtype(gemm_dtype).itemsize
    bo = jnp.dtype(out_dtype).itemsize

    H128 = _round_up(H, 128)      # lane-dense output tiles (unmasked vst)
    R16 = _round_up(R, 16)        # sublane-aligned rows (bf16 packing)

    def vmem_bytes(tr, th, cached):
        b = 2 * tr * D * bx       # x tile, double-buffered
        b += 2 * D * th * bg      # weight tile, double-buffered
        b += 2 * 8 * th * 4       # bias tile (sublane-padded), double-buffered
        b += 2 * tr * th * bo     # output tile, double-buffered
        if cached:
            b += tr * D * bg      # normalized-row scratch
        return b

    TR = min(_round_up(row_tile, 16), R16)
    # v7x megacore: keep >= 2 row tiles when there is enough work.
    if R16 // TR < 2 and R16 >= 512:
        TR = _round_up((R16 + 1) // 2, 16)

    # ---- 1) try weight-resident: W is DMA'd from HBM exactly once ----------
    if vmem_bytes(TR, H128, cached=False) <= budget:
        TH = H128
    else:
        # ---- 2) stream W in lane-dense column tiles -------------------------
        TH = min(_round_up(h_tile, 128), H128)
        th_floor = 256 if H128 >= 256 else 128
        tr_floor = min(TR, 256)
        # Shrink TH first, then TR — keeps the MXU fed and keeps the weight
        # stream's arithmetic intensity (~TR flops/byte) high.
        while TH > th_floor and vmem_bytes(TR, TH, cached=True) > budget:
            TH = max(th_floor, (TH // 2) // 128 * 128)
        while TR > tr_floor and vmem_bytes(TR, TH, cached=True) > budget:
            TR = max(tr_floor, _round_up(TR // 2, 16))

    R_pad = _round_up(R, TR)
    H_pad = _round_up(H, TH)
    NR = R_pad // TR
    NH = H_pad // TH

    if R_pad != R:
        x2 = jnp.pad(x2, ((0, R_pad - R), (0, 0)))
    if H_pad != H:
        w_eff = jnp.pad(w_eff, ((0, 0), (0, H_pad - H)))
        b_eff = jnp.pad(b_eff, ((0, 0), (0, H_pad - H)))

    x_bytes = R_pad * D * bx
    w_bytes = D * H_pad * bg

    if NH == 1 or w_bytes > x_bytes:
        # H-outer / rows-inner: weight block index constant along the inner
        # axis => each W column tile fetched from HBM exactly once (x is
        # re-streamed NH times).  LayerNorm recomputed per step (hidden under
        # the MXU).  No carried state -> both axes parallel (megacore-safe).
        grid = (NH, NR)
        in_specs = [
            pl.BlockSpec((TR, D), lambda j, i: (i, 0)),
            pl.BlockSpec((D, TH), lambda j, i: (0, j)),
            pl.BlockSpec((1, TH), lambda j, i: (0, j)),
        ]
        out_spec = pl.BlockSpec((TR, TH), lambda j, i: (i, j))
        kernel = _ln_matmul_kernel
        scratch = []
        dims = ("parallel", "parallel")
    else:
        # rows-outer / H-inner: x fetched once, W re-streamed per row tile;
        # normalized rows cached in VMEM scratch at j == 0 (carried state,
        # so the inner axis must be "arbitrary").
        grid = (NR, NH)
        in_specs = [
            pl.BlockSpec((TR, D), lambda i, j: (i, 0)),
            pl.BlockSpec((D, TH), lambda i, j: (0, j)),
            pl.BlockSpec((1, TH), lambda i, j: (0, j)),
        ]
        out_spec = pl.BlockSpec((TR, TH), lambda i, j: (i, j))
        kernel = _ln_cached_matmul_kernel
        scratch = [pltpu.VMEM((TR, D), gemm_dtype)]
        dims = ("parallel", "arbitrary")

    out = pl.pallas_call(
        kernel,
        out_shape=jax.ShapeDtypeStruct((R_pad, H_pad), out_dtype),
        grid_spec=pltpu.PrefetchScalarGridSpec(
            num_scalar_prefetch=0,
            grid=grid,
            in_specs=in_specs,
            out_specs=out_spec,
            scratch_shapes=scratch,
        ),
        compiler_params=pltpu.CompilerParams(
            dimension_semantics=dims,
            vmem_limit_bytes=int(vmem_limit),
        ),
    )(x2, w_eff, b_eff)

    return out[:R, :H].reshape(*lead, H)


def prenorm(x, gamma, beta, w, wb, *, gemm_dtype=None, **tile_kwargs):
    """Convenience wrapper: fold + apply.  Prefer hoisting fold_prenorm_params."""
    w_eff, b_eff = fold_prenorm_params(gamma, beta, w, wb, gemm_dtype=gemm_dtype)
    return prenorm_apply(x, w_eff, b_eff, **tile_kwargs)


def prenorm_ref(x, gamma, beta, w, wb):
    xf = x.astype(jnp.float32)
    mean = jnp.mean(xf, axis=-1, keepdims=True)
    var = jnp.mean((xf - mean) ** 2, axis=-1, keepdims=True)
    y = (xf - mean) / jnp.sqrt(var + EPS)
    y = y * gamma.reshape(1, 1, -1) + beta.reshape(1, 1, -1)
    return (y @ w.astype(jnp.float32) + wb.reshape(1, 1, -1)).astype(x.dtype)


if __name__ == "__main__":
    B, N, D, H = 2, 8, 32, 32

    key = jax.random.PRNGKey(0)
    kx, kw, kg, kb = jax.random.split(key, 4)

    x = jax.random.normal(kx, (B, N, D), dtype=jnp.float32)

    # Non-trivial LayerNorm affine (exercises the gamma/beta fold).
    gamma = 1.0 + 0.1 * jax.random.normal(kg, (1, D), dtype=jnp.float32)
    beta = 0.1 * jax.random.normal(kb, (1, D), dtype=jnp.float32)

    # Deterministic wrapped-fn (Linear) params.
    w = jax.random.normal(kw, (D, H), dtype=jnp.float32) * 0.05
    wb = 0.01 * jnp.ones((1, H), dtype=jnp.float32)

    ref = prenorm_ref(x, gamma, beta, w, wb)

    # Exact f32 GEMM path (tight tolerance).  Fold hoisted out of hot path.
    w_eff32, b_eff32 = fold_prenorm_params(gamma, beta, w, wb,
                                           gemm_dtype=jnp.float32)
    out32 = prenorm_apply(x, w_eff32, b_eff32)
    jax.block_until_ready(out32)
    assert out32.shape == (B, N, H)
    err32 = jnp.max(jnp.abs(out32 - ref))
    assert err32 < 1e-3, f"f32 GEMM path error too large: {err32}"

    # Default bf16 GEMM operands (f32 stats/accum) — bf16-appropriate tolerance.
    w_eff16, b_eff16 = fold_prenorm_params(gamma, beta, w, wb)
    out16 = prenorm_apply(x, w_eff16, b_eff16)
    jax.block_until_ready(out16)
    err16 = jnp.max(jnp.abs(out16.astype(jnp.float32) - ref))
    assert err16 < 2e-2, f"bf16 GEMM path error too large: {err16}"

    print("KERNEL_OK")
</pallas_src>

<mosaic_0001>
module attributes {stable_mosaic.version = 11 : i64} {
  func.func @_ln_matmul_kernel(%arg0: i32, %arg1: i32, %arg2: memref<16x32xf32, #tpu.memory_space<vmem>>, %arg3: memref<32x128xf32, #tpu.memory_space<vmem>>, %arg4: memref<1x128xf32, #tpu.memory_space<vmem>>, %arg5: memref<16x128xf32, #tpu.memory_space<vmem>>) attributes {dimension_semantics = [#tpu.dimension_semantics<parallel>, #tpu.dimension_semantics<parallel>], iteration_bounds = array<i64: 1, 1>, scalar_prefetch = 0 : i64, scratch_operands = 0 : i64, tpu.core_type = #tpu.core_type<tc>, window_params = [{transform_indices = @transform_0, window_bounds = array<i64: 16, 32>}, {transform_indices = @transform_1, window_bounds = array<i64: 32, 128>}, {transform_indices = @transform_2, window_bounds = array<i64: 1, 128>}, {transform_indices = @transform_3, window_bounds = array<i64: 16, 128>}]} {
    %c0 = arith.constant 0 : index
    %c0_0 = arith.constant 0 : index
    %0 = vector.load %arg2[%c0, %c0_0] : memref<16x32xf32, #tpu.memory_space<vmem>>, vector<16x32xf32>
    %cst = arith.constant dense<0.000000e+00> : vector<16xf32>
    %1 = vector.multi_reduction <add>, %0, %cst [1] : vector<16x32xf32> to vector<16xf32>
    %2 = vector.shape_cast %1 : vector<16xf32> to vector<16x1xf32>
    %cst_1 = arith.constant 3.125000e-02 : f32
    %3 = vector.broadcast %cst_1 : f32 to vector<16x1xf32>
    %4 = arith.mulf %2, %3 : vector<16x1xf32>
    %5 = arith.mulf %0, %0 : vector<16x32xf32>
    %cst_2 = arith.constant dense<0.000000e+00> : vector<16xf32>
    %6 = vector.multi_reduction <add>, %5, %cst_2 [1] : vector<16x32xf32> to vector<16xf32>
    %7 = vector.shape_cast %6 : vector<16xf32> to vector<16x1xf32>
    %cst_3 = arith.constant 3.125000e-02 : f32
    %8 = vector.broadcast %cst_3 : f32 to vector<16x1xf32>
    %9 = arith.mulf %7, %8 : vector<16x1xf32>
    %10 = arith.mulf %4, %4 : vector<16x1xf32>
    %11 = arith.subf %9, %10 : vector<16x1xf32>
    %12 = vector.broadcast %4 : vector<16x1xf32> to vector<16x32xf32>
    %13 = arith.subf %0, %12 : vector<16x32xf32>
    %cst_4 = arith.constant 9.99999974E-6 : f32
    %14 = vector.broadcast %cst_4 : f32 to vector<16x1xf32>
    %15 = arith.addf %11, %14 : vector<16x1xf32>
    %16 = math.rsqrt %15 : vector<16x1xf32>
    %17 = vector.broadcast %16 : vector<16x1xf32> to vector<16x32xf32>
    %18 = arith.mulf %13, %17 : vector<16x32xf32>
    %c0_5 = arith.constant 0 : index
    %c0_6 = arith.constant 0 : index
    %19 = vector.load %arg3[%c0_5, %c0_6] : memref<32x128xf32, #tpu.memory_space<vmem>>, vector<32x128xf32>
    %cst_7 = arith.constant dense<0.000000e+00> : vector<16x128xf32>
    %20 = tpu.matmul %18, %19, %cst_7 {dimension_numbers = #tpu.dot_dimension_numbers<[1], [0], [0], [1], [0, 0, 1, 1], [], []>} : vector<16x32xf32>, vector<32x128xf32>, vector<16x128xf32> -> vector<16x128xf32>
    %c0_8 = arith.constant 0 : index
    %c0_9 = arith.constant 0 : index
    %21 = vector.load %arg4[%c0_8, %c0_9] : memref<1x128xf32, #tpu.memory_space<vmem>>, vector<1x128xf32>
    %22 = vector.broadcast %21 : vector<1x128xf32> to vector<16x128xf32>
    %23 = arith.addf %20, %22 : vector<16x128xf32>
    %c0_10 = arith.constant 0 : index
    %c0_11 = arith.constant 0 : index
    %24 = vector.load %arg5[%c0_10, %c0_11] : memref<16x128xf32, #tpu.memory_space<vmem>>, vector<16x128xf32>
    tpu.vector_store %arg5[%c0_10, %c0_11], %23 {strides = array<i32>} : memref<16x128xf32, #tpu.memory_space<vmem>>, vector<16x128xf32>,
    return
  }
  func.func @transform_0(%arg0: i32, %arg1: i32) -> (i32, i32) {
    %c0_i32 = arith.constant 0 : i32
    %c0_i32_0 = arith.constant 0 : i32
    return %arg1, %c0_i32 : i32, i32
  }
  func.func @transform_1(%arg0: i32, %arg1: i32) -> (i32, i32) {
    %c0_i32 = arith.constant 0 : i32
    %c0_i32_0 = arith.constant 0 : i32
    return %c0_i32, %arg0 : i32, i32
  }
  func.func @transform_2(%arg0: i32, %arg1: i32) -> (i32, i32) {
    %c0_i32 = arith.constant 0 : i32
    %c0_i32_0 = arith.constant 0 : i32
    return %c0_i32, %arg0 : i32, i32
  }
  func.func @transform_3(%arg0: i32, %arg1: i32) -> (i32, i32) {
    %c0_i32 = arith.constant 0 : i32
    return %arg1, %arg0 : i32, i32
  }
}

</mosaic_0001>

<bundles_post_ra>
// kernel: tpu_custom_call.1
= control target key start
LH: loop header
LB: loop body
LE: loop exit
PB: predicated region body
PF: predicated region fallthrough
CT: control target
= control target key end

     0   :  { %8 = vsyncpa [#allocation3], 0  ;;  %s335_s0 = inlined_call_operand.hbm [shape: f32[16,32], index: 0, kind: input, shape index: {}]   ;;  %s336_s1 = inlined_call_operand.hbm [shape: f32[32,128], index: 1, kind: input, shape index: {}]   ;;  %s337_s2 = inlined_call_operand.vmem [shape: f32[1,128], index: 2, kind: input, shape index: {}]   ;;  %s338_s3 = inlined_call_operand.hbm [shape: f32[16,128], index: 3, kind: output, shape index: {}]  }
   0x1   :  { %9 = vsyncpa [#allocation6], 0 }
   0x2   :  { %10 = vsyncpa [#allocation4], 0  ;;  %s283_s12 = smov [#allocation2]  }
   0x3   :  { %s16_s13 = sshll.u32 %s283_s12, 4  ;;  %s17_s13 = int_to_ptr.vmem [resolvable:$true] %s16_s13 }
   0x4   :  { %s225_s14 = scalar_lea.vmem %s17_s13, 256  ;;  %p230_p1 = scmp.lt.s32.totalorder %s17_s13, %s17_s13 }
   0x5   :  { %p226_p0 = scmp.ne.s32.totalorder %s17_s13, %s225_s14  ;;  %p231_p2 = scmp.lt.s32.totalorder %s225_s14, %s225_s14 }
   0x7   :  { %p232_p3 = por %p231_p2, %p230_p1 }
   0x9   :  { %p233_p4 = pnand %p232_p3, %p226_p0 }
   0xb   :  { %236 = shalt.err (!%p233_p4)
}
   0xc   :  { %s284_s15 = smov 128   ;;  %s285_s16 = smov 8  }
   0xd   :  { %22 = dma.hbm_to_vmem [thread:$0]  %s335_s0, 256, %s17_s13, [#allocation3], %s284_s15, %s284_s15, %s285_s16  }
   0xe   :  { %s286_s19 = smov [#allocation5]  }
   0xf   :  { %s28_s20 = sshll.u32 %s286_s19, 4  ;;  %s29_s20 = int_to_ptr.vmem [resolvable:$true] %s28_s20 }
  0x10   :  { %s245_s21 = scalar_lea.vmem %s29_s20, 512  ;;  %p250_p6 = scmp.lt.s32.totalorder %s29_s20, %s29_s20 }
  0x11   :  { %p246_p5 = scmp.ne.s32.totalorder %s29_s20, %s245_s21  ;;  %p251_p7 = scmp.lt.s32.totalorder %s245_s21, %s245_s21 }
  0x13   :  { %p252_p8 = por %p251_p7, %p250_p6 }
  0x15   :  { %p253_p9 = pnand %p252_p8, %p246_p5 }
  0x17   :  { %256 = shalt.err (!%p253_p9)
}
  0x18   :  { %34 = dma.hbm_to_vmem [thread:$0]  %s336_s1, 512, %s29_s20, [#allocation6], %s284_s15, %s284_s15, %s285_s16  }
  0x19   :  { %277 = dma.done.wait [#allocation3], 256  }
  0x1a   :  { %278 = vsyncadd [#allocation3], 4294967040 }
  0x1b   :  { %279 = dma.done.wait [#allocation6], 512  }
  0x1c   :  { %280 = vsyncadd [#allocation6], 4294966784  ;;  %vm45_vm0 = vcmask 261120   ;;  %v43_v0 = vld [vmem:[#allocation2] sm:$0xff]  ;;  %v44_v1 = vld [vmem:[#allocation2 + $0x8] sm:$0xff]  ;;  %s287_s24 = smov [#allocation7]  }
  0x1d   :  { %v46_v2 = vsel %vm45_vm0, %v43_v0, 0.0  ;;  %v54_v3 = vmul.f32 %v43_v0, %v43_v0  ;;  %v55_v4 = vmul.f32 %v44_v1, %v44_v1  ;;  %v49_v6 = vsel %vm45_vm0, %v44_v1, 0.0  ;;  %v79_v8 = vld [vmem:[#allocation5 + $0x18] sm:$0xff]  ;;  %v78_v9 = vld [vmem:[#allocation5 + $0x10] sm:$0xff]  ;;  %v77_v10 = vld [vmem:[#allocation5 + $0x8] sm:$0xff]  ;;  %s175_s25 = sshll.u32 %s287_s24, 4  ;;  %s176_s25 = int_to_ptr.vmem [resolvable:$true] %s175_s25 }
  0x1e   :  { %47 = vadd.xlane.f32.xlu0 %v46_v2  ;;  %197 = vmatprep.subr.mxu0 %v79_v8  ;;  %v76_v11 = vld [vmem:[#allocation5] sm:$0xff]  ;;  %v188_v32 = vld [vmem:[%s337_s2] ss:$0 sm:$0xff]  ;;  %s257_s26 = scalar_lea.vmem %s176_s25, 256  ;;  %p262_p11 = scmp.lt.s32.totalorder %s176_s25, %s176_s25 }
  0x1f   :  { %v56_v5 = vsel %vm45_vm0, %v54_v3, 0.0  ;;  %v59_v7 = vsel %vm45_vm0, %v55_v4, 0.0  ;;  %198 = vmatpush3.msra.mxu0 %v79_v8  ;;  %p258_p10 = scmp.ne.s32.totalorder %s176_s25, %s257_s26  ;;  %p263_p12 = scmp.lt.s32.totalorder %s257_s26, %s257_s26 }
  0x20   :  { %57 = vadd.xlane.f32.xlu1 %v56_v5  ;;  %199 = vmatprep.subr.mxu0 %v78_v9 }
  0x21   :  { %200 = vmatpush3.msra.mxu0 %v78_v9  ;;  %p264_p13 = por %p263_p12, %p262_p11 }
  0x22   :  { %50 = vadd.xlane.f32.xlu0 %v49_v6  ;;  %201 = vmatprep.subr.mxu0 %v77_v10 }
  0x23   :  { %202 = vmatpush3.msra.mxu0 %v77_v10  ;;  %p265_p0 = pnand %p264_p13, %p258_p10 }
  0x24   :  { %60 = vadd.xlane.f32.xlu1 %v59_v7  ;;  %203 = vmatprep.subr.mxu0 %v76_v11 }
  0x25   :  { %204 = vmatpush3.msra.mxu0 %v76_v11 }
  0xa7   :  { %v48_v12 = vpop.xlane.xlu0 %47 }
  0xa8   :  { %v52_v13 = vmul.f32 0.03125, %v48_v12 }
  0xa9   :  { %v58_v14 = vpop.xlane.xlu1 %57 }
  0xaa   :  { %v64_v15 = vmul.f32 %v52_v13, %v52_v13  ;;  %v62_v16 = vmul.f32 0.03125, %v58_v14  ;;  %v68_v26 = vsub.f32 %v43_v0, %v52_v13 }
  0xab   :  { %v51_v17 = vpop.xlane.xlu0 %50 }
  0xac   :  { %v66_v18 = vsub.f32 %v62_v16, %v64_v15  ;;  %v53_v19 = vmul.f32 0.03125, %v51_v17 }
  0xad   :  { %v61_v20 = vpop.xlane.xlu1 %60 }
  0xae   :  { %v70_v21 = vadd.f32 1e-05, %v66_v18  ;;  %v65_v22 = vmul.f32 %v53_v19, %v53_v19  ;;  %v63_v23 = vmul.f32 0.03125, %v61_v20  ;;  %v69_v29 = vsub.f32 %v44_v1, %v53_v19 }
  0xb0   :  { %213 = vrsqrt.f32 %v70_v21  ;;  %v67_v24 = vsub.f32 %v63_v23, %v65_v22 }
  0xb2   :  { %v71_v25 = vadd.f32 1e-05, %v67_v24 }
  0xb4   :  { %215 = vrsqrt.f32 %v71_v25 }
  0xbd   :  { %v214_v27 = vpop.eup %213 }
  0xbe   :  { %v74_v28 = vmul.f32 %v214_v27, %v68_v26 }
  0xc0   :  { %205 = vmatprep.mubr.msk.f32.mxu0 %vm45_vm0, %v74_v28 }
  0xc1   :  { %v216_v30 = vpop.eup %215 }
  0xc2   :  { %v75_v31 = vmul.f32 %v216_v30, %v69_v29 }
  0xc4   :  { %206 = vmatmul.mubr.msk.f32.vlgmr.msra.gmra.mxu0 %vm45_vm0, %v75_v31 }
 0x184   :  { %v207_v33 = vpop.f32.mrf.mxu0 }
 0x185   :  { %v165_v34 = vadd.f32 %v207_v33, %v188_v32 }
 0x186   :  { %v159_v35 = vpop.f32.mrf.mxu0 }
 0x187   :  { %169 = vst [vmem:[#allocation7 + $0x8] sm:$0xff] %v165_v34  ;;  %v160_v36 = vadd.f32 %v188_v32, %v159_v35 }
 0x189   :  { %168 = vst [vmem:[#allocation7] sm:$0xff] %v160_v36 }
 0x18a   :  { %268 = shalt.err (!%p265_p0)
}
 0x18b   :  { %181 = dma.vmem_to_hbm [thread:$0]  %s176_s25, 256, %s338_s3, [#allocation4], %s284_s15, %s284_s15, %s285_s16  }
 0x18c   :  { %281 = dma.done.wait [#allocation4], 256  }
 0x18d   :  { %282 = vsyncadd [#allocation4], 4294967040 }
 0x18e   :  { %185 = vsyncpa [#allocation3], 1 }
 0x18f   :  { %186 = vsyncpa [#allocation6], 1 }
 0x190   :  { %187 = vsyncpa [#allocation4], 1 }

</bundles_post_ra>
